<compile_context>
chip_gen: v7x
topology: tpu7x:2x2x1
jax: 0.10.0
libtpu: 0.0.40
codegen_flags: <defaults>
</compile_context>

<pallas_src>
import functools

import jax
import jax.numpy as jnp
from jax.experimental import pallas as pl
from jax.experimental.pallas import tpu as pltpu

BN_EPS = 1e-5
GEM_EPS = 1e-6


def _adaptive_head_kernel(scal_ref,     # SMEM (1, 2): [p, 1/p]
                          patches_ref,  # VMEM (TB*P_pad, K)   bf16 im2col patches
                          avg_ref,      # VMEM (TB, TB*P_pad)  f32 block-diag GeM averaging
                          wc_ref,       # VMEM (K, Hdim)       bf16 conv weight (BN folded)
                          bc_ref,       # VMEM (1, Hdim)       f32 conv bias (BN folded)
                          wl_ref,       # VMEM (Hdim, Out)     f32 linear weight (transposed)
                          bl_ref,       # VMEM (1, Out)        f32 linear bias
                          out_ref):     # VMEM (TB, Out)
    p = scal_ref[0, 0]
    inv_p = scal_ref[0, 1]

    # --- Conv2d(in, h_dim, 2) + eval-mode BatchNorm2d, folded into one MXU matmul ---
    y = jnp.dot(patches_ref[...], wc_ref[...],
                preferred_element_type=jnp.float32)            # (TB*P_pad, Hdim) f32
    y = y + bc_ref[...]

    # --- GeM pooling: clamp, x**p (EUP exp/log), masked per-sample mean via a
    #     block-diagonal averaging matmul (pad rows have weight 0, /P true count) ---
    yc = jnp.maximum(y, GEM_EPS)
    yp = jnp.exp(p * jnp.log(yc))                              # yc ** p   (yc > 0)
    pooled = jnp.dot(avg_ref[...], yp,
                     preferred_element_type=jnp.float32)       # (TB, Hdim)
    pooled = jnp.exp(jnp.log(pooled) * inv_p)                  # pooled ** (1/p)

    # --- Dropout2d: identity in eval mode ---
    # TODO(synk): training-mode Dropout2d / batch-stat BN not implemented (eval semantics only).

    # --- ReLU ---
    feat = jnp.maximum(pooled, 0.0)                            # (TB, Hdim)

    # --- Linear(h_dim, out_features): one batched matmul + one (TB, Out) store ---
    out_ref[...] = jnp.dot(feat, wl_ref[...],
                           preferred_element_type=jnp.float32) + bl_ref[...]


def _im2col_2x2(x_nchw):
    """(B, C, H, W) -> (B, Ho*Wo, C*4) with K ordered (c, kh, kw) row-major."""
    B, C, H, W = x_nchw.shape
    Ho, Wo = H - 1, W - 1
    taps = []
    for di in range(2):
        for dj in range(2):
            taps.append(x_nchw[:, :, di:di + Ho, dj:dj + Wo])  # (B, C, Ho, Wo)
    patch = jnp.stack(taps, axis=2)                            # (B, C, 4, Ho, Wo)
    return patch.transpose(0, 3, 4, 1, 2).reshape(B, Ho * Wo, C * 4)
    # TODO(synk): at production Cin/H/W, replace im2col (4x HBM duplication) with a
    # 4-tap shifted-matmul formulation reading the NHWC activation directly, and
    # tile K/Hdim (+ vmem_limit_bytes, bf16 weights) for v7x's 64 MiB VMEM.


@functools.partial(jax.jit, static_argnames=("tb",))
def adaptive_head_forward(x_nchw, params, *, tb=8):
    """AdaptiveHead forward (eval mode) via the Pallas kernel.

    x_nchw: (B, Cin, H, W) float32, PyTorch NCHW convention.
    """
    B, Cin, H, W = x_nchw.shape
    Ho, Wo = H - 1, W - 1
    P = Ho * Wo
    P_pad = ((P + 7) // 8) * 8                          # pad spatial rows to sublane multiple
    K = Cin * 4

    wc = params["conv_w"]                               # (Hdim, Cin, 2, 2) PyTorch OIHW
    Hdim = wc.shape[0]
    wc_mat = wc.reshape(Hdim, K).T.astype(jnp.float32)  # (K, Hdim), K order = (c, kh, kw)

    # Fold eval-mode BatchNorm2d + conv bias into the conv weight/bias.
    s = params["bn_w"] * jax.lax.rsqrt(params["bn_var"] + BN_EPS)        # (Hdim,)
    wc_fold = (wc_mat * s[None, :]).astype(jnp.bfloat16)                 # (K, Hdim) bf16
    bc_fold = ((params["conv_b"] - params["bn_mean"]) * s
               + params["bn_b"]).reshape(1, Hdim).astype(jnp.float32)

    wl = params["lin_w"].T.astype(jnp.float32)          # (Hdim, Out)  (PyTorch stores (Out, Hdim))
    Out = wl.shape[1]
    bl = params["lin_b"].reshape(1, Out).astype(jnp.float32)

    p = params["gem_p"].reshape(()).astype(jnp.float32)
    scal = jnp.stack([p, 1.0 / p]).reshape(1, 2)        # [p, 1/p] -> SMEM (1/p hoisted)

    # Batch tiling: TB samples per grid step (TB == B if B <= tb keeps the
    # (TB, Out) output block equal to the full output dims, hence legal).
    TB = B if B <= tb else tb
    B_pad = ((B + TB - 1) // TB) * TB
    grid_b = B_pad // TB

    patches = _im2col_2x2(x_nchw)                                        # (B, P, K)
    patches = jnp.pad(patches, ((0, B_pad - B), (0, P_pad - P), (0, 0)))
    patches = patches.reshape(B_pad * P_pad, K).astype(jnp.bfloat16)     # (B_pad*P_pad, K)

    # Block-diagonal GeM averaging matrix: avg[t, t*P_pad + r] = 1/P for r < P else 0.
    rows = jnp.arange(TB * P_pad)
    avg_mat = (((rows[None, :] // P_pad) == jnp.arange(TB)[:, None])
               & ((rows[None, :] % P_pad) < P)).astype(jnp.float32) / float(P)

    const = lambda b: (0, 0)                            # constant index_map -> weights stay resident
    out = pl.pallas_call(
        _adaptive_head_kernel,
        out_shape=jax.ShapeDtypeStruct((B_pad, Out), jnp.float32),
        grid=(grid_b,),
        in_specs=[
            pl.BlockSpec(memory_space=pltpu.MemorySpace.SMEM),           # [p, 1/p]
            pl.BlockSpec((TB * P_pad, K), lambda b: (b, 0)),             # patches (per step)
            pl.BlockSpec((TB, TB * P_pad), const),                       # GeM averaging matrix
            pl.BlockSpec((K, Hdim), const),                              # folded conv weight
            pl.BlockSpec((1, Hdim), const),                              # folded conv bias
            pl.BlockSpec((Hdim, Out), const),                            # linear weight
            pl.BlockSpec((1, Out), const),                               # linear bias
        ],
        out_specs=pl.BlockSpec((TB, Out), lambda b: (b, 0)),
        compiler_params=pltpu.CompilerParams(
            dimension_semantics=("parallel",)),
    )(scal, patches, avg_mat, wc_fold, bc_fold, wl, bl)
    return out[:B]


def _reference(x_nchw, params):
    """Pure-JAX reference (independent conv path, all f32) for validation."""
    wc = params["conv_w"]
    Hdim = wc.shape[0]
    y = jax.lax.conv_general_dilated(
        x_nchw, wc, window_strides=(1, 1), padding="VALID",
        dimension_numbers=("NCHW", "OIHW", "NCHW"))
    y = y + params["conv_b"].reshape(1, Hdim, 1, 1)
    inv_std = jax.lax.rsqrt(params["bn_var"] + BN_EPS)
    y = ((y - params["bn_mean"].reshape(1, Hdim, 1, 1))
         * inv_std.reshape(1, Hdim, 1, 1)
         * params["bn_w"].reshape(1, Hdim, 1, 1)
         + params["bn_b"].reshape(1, Hdim, 1, 1))
    p = params["gem_p"][0]
    yc = jnp.maximum(y, GEM_EPS) ** p
    pooled = jnp.mean(yc, axis=(2, 3)) ** (1.0 / p)            # (B, Hdim)
    feat = jnp.maximum(pooled, 0.0)
    return feat @ params["lin_w"].T + params["lin_b"]


def _init_params(key, in_features, out_features, factor=2):
    h_dim = in_features // factor
    ks = jax.random.split(key, 8)
    return {
        "conv_w": 0.1 * jax.random.normal(ks[0], (h_dim, in_features, 2, 2), jnp.float32),
        "conv_b": 0.1 * jax.random.normal(ks[1], (h_dim,), jnp.float32),
        "bn_w": 1.0 + 0.1 * jax.random.normal(ks[2], (h_dim,), jnp.float32),
        "bn_b": 0.1 * jax.random.normal(ks[3], (h_dim,), jnp.float32),
        "bn_mean": 0.1 * jax.random.normal(ks[4], (h_dim,), jnp.float32),
        "bn_var": 0.5 + jnp.abs(jax.random.normal(ks[5], (h_dim,), jnp.float32)),
        "lin_w": 0.1 * jax.random.normal(ks[6], (out_features, h_dim), jnp.float32),
        "lin_b": 0.1 * jax.random.normal(ks[7], (out_features,), jnp.float32),
        "gem_p": jnp.ones((1,), jnp.float32) * 3.0,            # GeM p init (ones(1)*3)
    }


if __name__ == "__main__":
    # B=16 with TB=8 -> grid=(2,) parallel steps (both v7x TCs busy),
    # TB*P_pad = 8*56 = 448 rows per conv matmul (>=256, good v6e MXU depth).
    B, Cin, H, W = 16, 32, 8, 8
    out_features = 8

    key = jax.random.PRNGKey(0)
    kx, kp = jax.random.split(key)
    x = jax.random.normal(kx, (B, Cin, H, W), jnp.float32)
    params = _init_params(kp, Cin, out_features, factor=2)

    y = adaptive_head_forward(x, params)
    y = jax.block_until_ready(y)

    y_ref = _reference(x, params)
    assert y.shape == (B, out_features), y.shape
    # bf16 MXU operands (f32 accumulate) vs a pure-f32 reference -> relaxed tolerance.
    assert jnp.allclose(y, y_ref, atol=3e-2, rtol=3e-2), (
        float(jnp.max(jnp.abs(y - y_ref))), y, y_ref)

    print("KERNEL_OK")
</pallas_src>

<mosaic_0001>
module attributes {stable_mosaic.version = 11 : i64} {
  func.func @_adaptive_head_kernel(%arg0: i32, %arg1: memref<1x2xf32, #tpu.memory_space<smem>>, %arg2: memref<448x128xbf16, #tpu.memory_space<vmem>>, %arg3: memref<8x448xf32, #tpu.memory_space<vmem>>, %arg4: memref<128x16xbf16, #tpu.memory_space<vmem>>, %arg5: memref<1x16xf32, #tpu.memory_space<vmem>>, %arg6: memref<16x8xf32, #tpu.memory_space<vmem>>, %arg7: memref<1x8xf32, #tpu.memory_space<vmem>>, %arg8: memref<8x8xf32, #tpu.memory_space<vmem>>) attributes {dimension_semantics = [#tpu.dimension_semantics<parallel>], iteration_bounds = array<i64: 2>, scalar_prefetch = 0 : i64, scratch_operands = 0 : i64, tpu.core_type = #tpu.core_type<tc>, window_params = [{transform_indices = @transform_0, window_bounds = array<i64: 1, 2>}, {transform_indices = @transform_1, window_bounds = array<i64: 448, 128>}, {pipeline_mode = #tpu.pipeline_mode<synchronous>, transform_indices = @transform_2, window_bounds = array<i64: 8, 448>}, {pipeline_mode = #tpu.pipeline_mode<synchronous>, transform_indices = @transform_3, window_bounds = array<i64: 128, 16>}, {pipeline_mode = #tpu.pipeline_mode<synchronous>, transform_indices = @transform_4, window_bounds = array<i64: 1, 16>}, {pipeline_mode = #tpu.pipeline_mode<synchronous>, transform_indices = @transform_5, window_bounds = array<i64: 16, 8>}, {pipeline_mode = #tpu.pipeline_mode<synchronous>, transform_indices = @transform_6, window_bounds = array<i64: 1, 8>}, {transform_indices = @transform_7, window_bounds = array<i64: 8, 8>}]} {
    %c0 = arith.constant 0 : index
    %c0_0 = arith.constant 0 : index
    %0 = memref.load %arg1[%c0, %c0_0] : memref<1x2xf32, #tpu.memory_space<smem>>
    %c0_1 = arith.constant 0 : index
    %c1 = arith.constant 1 : index
    %1 = memref.load %arg1[%c0_1, %c1] : memref<1x2xf32, #tpu.memory_space<smem>>
    %c0_2 = arith.constant 0 : index
    %c0_3 = arith.constant 0 : index
    %2 = vector.load %arg2[%c0_2, %c0_3] : memref<448x128xbf16, #tpu.memory_space<vmem>>, vector<448x128xbf16>
    %c0_4 = arith.constant 0 : index
    %c0_5 = arith.constant 0 : index
    %3 = vector.load %arg4[%c0_4, %c0_5] : memref<128x16xbf16, #tpu.memory_space<vmem>>, vector<128x16xbf16>
    %cst = arith.constant dense<0.000000e+00> : vector<448x16xf32>
    %4 = tpu.matmul %2, %3, %cst {dimension_numbers = #tpu.dot_dimension_numbers<[1], [0], [0], [1], [0, 0, 1, 1], [], []>} : vector<448x128xbf16>, vector<128x16xbf16>, vector<448x16xf32> -> vector<448x16xf32>
    %c0_6 = arith.constant 0 : index
    %c0_7 = arith.constant 0 : index
    %5 = vector.load %arg5[%c0_6, %c0_7] : memref<1x16xf32, #tpu.memory_space<vmem>>, vector<1x16xf32>
    %6 = vector.broadcast %5 : vector<1x16xf32> to vector<448x16xf32>
    %7 = arith.addf %4, %6 : vector<448x16xf32>
    %cst_8 = arith.constant 9.99999997E-7 : f32
    %8 = vector.broadcast %cst_8 : f32 to vector<448x16xf32>
    %9 = arith.maximumf %7, %8 : vector<448x16xf32>
    %10 = math.log %9 : vector<448x16xf32>
    %11 = vector.broadcast %0 : f32 to vector<448x16xf32>
    %12 = arith.mulf %11, %10 : vector<448x16xf32>
    %13 = math.exp %12 : vector<448x16xf32>
    %c0_9 = arith.constant 0 : index
    %c0_10 = arith.constant 0 : index
    %14 = vector.load %arg3[%c0_9, %c0_10] : memref<8x448xf32, #tpu.memory_space<vmem>>, vector<8x448xf32>
    %cst_11 = arith.constant dense<0.000000e+00> : vector<8x16xf32>
    %15 = tpu.matmul %14, %13, %cst_11 {dimension_numbers = #tpu.dot_dimension_numbers<[1], [0], [0], [1], [0, 0, 1, 1], [], []>} : vector<8x448xf32>, vector<448x16xf32>, vector<8x16xf32> -> vector<8x16xf32>
    %16 = math.log %15 : vector<8x16xf32>
    %17 = vector.broadcast %1 : f32 to vector<8x16xf32>
    %18 = arith.mulf %16, %17 : vector<8x16xf32>
    %19 = math.exp %18 : vector<8x16xf32>
    %cst_12 = arith.constant 0.000000e+00 : f32
    %20 = vector.broadcast %cst_12 : f32 to vector<8x16xf32>
    %21 = arith.maximumf %19, %20 : vector<8x16xf32>
    %c0_13 = arith.constant 0 : index
    %c0_14 = arith.constant 0 : index
    %22 = vector.load %arg6[%c0_13, %c0_14] : memref<16x8xf32, #tpu.memory_space<vmem>>, vector<16x8xf32>
    %cst_15 = arith.constant dense<0.000000e+00> : vector<8x8xf32>
    %23 = tpu.matmul %21, %22, %cst_15 {dimension_numbers = #tpu.dot_dimension_numbers<[1], [0], [0], [1], [0, 0, 1, 1], [], []>} : vector<8x16xf32>, vector<16x8xf32>, vector<8x8xf32> -> vector<8x8xf32>
    %c0_16 = arith.constant 0 : index
    %c0_17 = arith.constant 0 : index
    %24 = vector.load %arg7[%c0_16, %c0_17] : memref<1x8xf32, #tpu.memory_space<vmem>>, vector<1x8xf32>
    %25 = vector.broadcast %24 : vector<1x8xf32> to vector<8x8xf32>
    %26 = arith.addf %23, %25 : vector<8x8xf32>
    %c0_18 = arith.constant 0 : index
    %c0_19 = arith.constant 0 : index
    %27 = vector.load %arg8[%c0_18, %c0_19] : memref<8x8xf32, #tpu.memory_space<vmem>>, vector<8x8xf32>
    tpu.vector_store %arg8[%c0_18, %c0_19], %26 {strides = array<i32>} : memref<8x8xf32, #tpu.memory_space<vmem>>, vector<8x8xf32>,
    return
  }
  func.func @transform_0(%arg0: i32) -> (i32, i32) {
    %c0_i32 = arith.constant 0 : i32
    %c0_i32_0 = arith.constant 0 : i32
    %c0_i32_1 = arith.constant 0 : i32
    return %c0_i32, %c0_i32_0 : i32, i32
  }
  func.func @transform_1(%arg0: i32) -> (i32, i32) {
    %c0_i32 = arith.constant 0 : i32
    %c0_i32_0 = arith.constant 0 : i32
    return %arg0, %c0_i32 : i32, i32
  }
  func.func @transform_2(%arg0: i32) -> (i32, i32) {
    %c0_i32 = arith.constant 0 : i32
    %c0_i32_0 = arith.constant 0 : i32
    %c0_i32_1 = arith.constant 0 : i32
    return %c0_i32, %c0_i32_0 : i32, i32
  }
  func.func @transform_3(%arg0: i32) -> (i32, i32) {
    %c0_i32 = arith.constant 0 : i32
    %c0_i32_0 = arith.constant 0 : i32
    %c0_i32_1 = arith.constant 0 : i32
    return %c0_i32, %c0_i32_0 : i32, i32
  }
  func.func @transform_4(%arg0: i32) -> (i32, i32) {
    %c0_i32 = arith.constant 0 : i32
    %c0_i32_0 = arith.constant 0 : i32
    %c0_i32_1 = arith.constant 0 : i32
    return %c0_i32, %c0_i32_0 : i32, i32
  }
  func.func @transform_5(%arg0: i32) -> (i32, i32) {
    %c0_i32 = arith.constant 0 : i32
    %c0_i32_0 = arith.constant 0 : i32
    %c0_i32_1 = arith.constant 0 : i32
    return %c0_i32, %c0_i32_0 : i32, i32
  }
  func.func @transform_6(%arg0: i32) -> (i32, i32) {
    %c0_i32 = arith.constant 0 : i32
    %c0_i32_0 = arith.constant 0 : i32
    %c0_i32_1 = arith.constant 0 : i32
    return %c0_i32, %c0_i32_0 : i32, i32
  }
  func.func @transform_7(%arg0: i32) -> (i32, i32) {
    %c0_i32 = arith.constant 0 : i32
    %c0_i32_0 = arith.constant 0 : i32
    return %arg0, %c0_i32 : i32, i32
  }
}

</mosaic_0001>

<bundles_post_ra>
// kernel: adaptive_head_forward.1
= control target key start
LH: loop header
LB: loop body
LE: loop exit
PB: predicated region body
PF: predicated region fallthrough
CT: control target
= control target key end

     0   :  { %12 = vsyncpa [#allocation3], 0  ;;  %s2124_s24 = smov 0   ;;  %s2462_s0 = inlined_call_operand.vmem [shape: f32[1,2], index: 0, kind: input, shape index: {}]   ;;  %s2463_s1 = inlined_call_operand.vmem [shape: bf16[896,128], index: 1, kind: input, shape index: {}]   ;;  %s2464_s2 = inlined_call_operand.vmem [shape: f32[8,448], index: 2, kind: input, shape index: {}]   ;;  %s2465_s3 = inlined_call_operand.vmem [shape: bf16[128,16], index: 3, kind: input, shape index: {}]   ;;  %s2466_s4 = inlined_call_operand.vmem [shape: f32[1,16], index: 4, kind: input, shape index: {}]   ;;  %s2467_s5 = inlined_call_operand.vmem [shape: f32[16,8], index: 5, kind: input, shape index: {}]   ;;  %s2468_s6 = inlined_call_operand.vmem [shape: f32[1,8], index: 6, kind: input, shape index: {}]   ;;  %s2469_s7 = inlined_call_operand.vmem [shape: f32[16,8], index: 7, kind: output, shape index: {}]  }
   0x1 LB: > { %s2130_s25 = sadd.s32 4294967295, %s2078_s24   ;;  %p1492_p0 = scmp.ge.s32.totalorder %s2078_s24, 1  ;;  %s2078_s24 = sphi %s2124_s24, %s18_s24  }
   0x2   : > { %p201_p1 = scmp.lt.s32.totalorder %s2078_s24, 3  ;;  %s214_s28 = sshll.u32 %s2462_s0, 4  ;;  %s215_s28 = int_to_ptr.vmem [resolvable:$true] %s214_s28 }
   0x3   : > { %p1774_p3 = scmp.eq.s32.totalorder %s2130_s25, 0  ;;  %s2053_s30 = scalar_lea.vmem %s215_s28, 16 }
   0x4   : > { %p2137_p2 = pnand %p1492_p0, %p201_p1  ;;  %p2054_p6 = scmp.ne.s32.totalorder %s215_s28, %s2053_s30 }
   0x5   : > { %p2061_p10 = scmp.lt.s32.totalorder %s215_s28, %s215_s28  ;;  %p2062_p11 = scmp.lt.s32.totalorder %s2053_s30, %s2053_s30 }
   0x6   : > { %p1770_p4 = pneg %p2137_p2 }
   0x7   : > { %p2063_p12 = por %p2062_p11, %p2061_p10 }
   0x8   : > { %p1771_p5 = pnand %p1774_p3, %p1770_p4 }
   0xa   : > { %p2055_p7 = pneg %p1771_p5 }
   0xc   : > { %p2056_p8 = pnand %p2055_p7, %p2054_p6 }
   0xe   : > { %p2057_p9 = pneg %p2056_p8 }
  0x10   : > { %p2064_p13 = pnand %p2063_p12, %p2057_p9 }
  0x12   : > { %2067 = shalt.err (!%p2064_p13)
}
  0x13   : > { %s2080_s8 = smov [#allocation2]   ;;  %251 = sbr.rel (%p2137_p2) target bundleno = 887 (0x377), region = 48 }
  0x14   : > { %1773 = dma.vmem_to_smem (!%p1771_p5), %s215_s28, 16, %s2080_s8, [#allocation3]  }
  0x1a   : > { %2073 = dma.done.wait (%p1774_p3), [#allocation3], 16  }
  0x1b   : > { %2075 = vsyncadd (%p1774_p3), [#allocation3], 4294967280 }
  0x1c   : > { %257 = sfence }
  0x1d   : > { %v1788_v0 = vld [vmem:[%s2465_s3] sm:$0xff]   ;;  %s283_s11 = smul.u32 56, %s2130_s25  ;;  %v1789_v1 = vld [vmem:[%s2465_s3 + $0x8] sm:$0xff]   ;;  %v1790_v2 = vld [vmem:[%s2465_s3 + $0x10] sm:$0xff]   ;;  %s294_s13 = sld [smem:[#allocation2]]  ;;  %vm1189_vm0 = vcmask 523264  }
  0x1e   : > { %1616 = vmatprep.subr.bf16.mxu0 %v1788_v0  ;;  %v1791_v3 = vld [vmem:[%s2465_s3 + $0x18] sm:$0xff]   ;;  %v1792_v5 = vld [vmem:[%s2465_s3 + $0x20] sm:$0xff]   ;;  %v1793_v6 = vld [vmem:[%s2465_s3 + $0x28] sm:$0xff]   ;;  %vm2082_vm1 = vmmov 0   ;;  %s1499_s28 = sld [smem:[#allocation2 + $0x1]]  ;;  %vm1349_vm2 = vcmask 130048  }
  0x1f   : > { %p284_p0 = scmp.lt.s32.totalorder %s283_s11, 111  ;;  %1617 = vmatpush3.bf16.msra.mxu0 %v1788_v0  ;;  %v1794_v7 = vld [vmem:[%s2465_s3 + $0x30] sm:$0xff]   ;;  %v1795_v8 = vld [vmem:[%s2465_s3 + $0x38] sm:$0xff]   ;;  %v1186_v36 = vld [vmem:[%s2464_s2 + $0x8] sm:$0xff]  ;;  %p289_p1 = scmp.lt.s32.totalorder %s2130_s25, 1  ;;  %vm1423_vm3 = vcmask 64512  }
  0x20   : > { %1618 = vmatprep.subr.bf16.mxu0 %v1789_v1  ;;  %1257 = vmatprep.mubr.f32.mxu1 %v1186_v36  ;;  %v2216_v37 = vld [vmem:[%s2466_s4] ss:$0 sm:$0xff] }
  0x21   : > { %s2472_s11 = smov (!%p284_p0, %s283_s11), 111  ;;  %s2474_s25 = smov (!%p289_p1, %s2130_s25), 1 }
  0x22   : > { %s1497_s16 = sshll.u32 %s2472_s11, 2  ;;  %s1498_s29 = sshll.u32 %s2474_s25, 3 }
  0x23   : > { %1619 = vmatpush3.bf16.msra.mxu0 %v1789_v1  ;;  %s2168_s21 = scalar_lea.vmem %s2463_s1, %s1497_s16  ;;  %v2226_v63 = vstv %s294_s13  ;;  %s292_s11 = scalar_lea.vmem %s2469_s7, %s1498_s29 }
  0x24   : > { %1620 = vmatprep.subr.bf16.mxu0 %v1790_v2  ;;  %v1796_v4 = vld [vmem:[%s2168_s21] sm:$0xff]   ;;  %v1797_v9 = vld [vmem:[%s2168_s21 + $0x8] sm:$0xff]   ;;  %v1798_v10 = vld [vmem:[%s2168_s21 + $0x10] sm:$0xff]  }
  0x25   : > { %1632 = vmatprep.mubr.bf16.mxu0 %v1796_v4  ;;  %v1799_v11 = vld [vmem:[%s2168_s21 + $0x18] sm:$0xff]   ;;  %v1800_v12 = vld [vmem:[%s2168_s21 + $0x20] sm:$0xff]   ;;  %v1801_v13 = vld [vmem:[%s2168_s21 + $0x28] sm:$0xff]  }
  0x26   : > { %v1802_v14 = vld [vmem:[%s2168_s21 + $0x30] sm:$0xff]   ;;  %v1803_v15 = vld [vmem:[%s2168_s21 + $0x38] sm:$0xff]   ;;  %v1804_v16 = vld [vmem:[%s2168_s21 + $0x40] sm:$0xff]  }
  0x27   : > { %1621 = vmatpush3.bf16.msra.mxu0 %v1790_v2  ;;  %v1805_v17 = vld [vmem:[%s2168_s21 + $0x48] sm:$0xff]   ;;  %v1806_v18 = vld [vmem:[%s2168_s21 + $0x50] sm:$0xff]   ;;  %v1807_v19 = vld [vmem:[%s2168_s21 + $0x58] sm:$0xff]  }
  0x28   : > { %1622 = vmatprep.subr.bf16.mxu0 %v1791_v3  ;;  %v1808_v20 = vld [vmem:[%s2168_s21 + $0x60] sm:$0xff]   ;;  %v1809_v21 = vld [vmem:[%s2168_s21 + $0x68] sm:$0xff]   ;;  %v1810_v22 = vld [vmem:[%s2168_s21 + $0x70] sm:$0xff]  }
  0x29   : > { %v1811_v23 = vld [vmem:[%s2168_s21 + $0x78] sm:$0xff]   ;;  %v1812_v24 = vld [vmem:[%s2168_s21 + $0x80] sm:$0xff]   ;;  %v1813_v25 = vld [vmem:[%s2168_s21 + $0x88] sm:$0xff]  }
  0x2a   : > { %v1814_v26 = vld [vmem:[%s2168_s21 + $0x90] sm:$0xff]   ;;  %v1815_v27 = vld [vmem:[%s2168_s21 + $0x98] sm:$0xff]   ;;  %v1816_v28 = vld [vmem:[%s2168_s21 + $0xa0] sm:$0xff]  }
  0x2b   : > { %1623 = vmatpush3.bf16.msra.mxu0 %v1791_v3  ;;  %v1817_v29 = vld [vmem:[%s2168_s21 + $0xa8] sm:$0xff]   ;;  %v1818_v30 = vld [vmem:[%s2168_s21 + $0xb0] sm:$0xff]   ;;  %v1819_v31 = vld [vmem:[%s2168_s21 + $0xb8] sm:$0xff]  }
  0x2c   : > { %1624 = vmatprep.subr.bf16.mxu0 %v1792_v5  ;;  %v1820_v32 = vld [vmem:[%s2168_s21 + $0xc0] sm:$0xff]   ;;  %v1821_v33 = vld [vmem:[%s2168_s21 + $0xc8] sm:$0xff]   ;;  %v1822_v34 = vld [vmem:[%s2168_s21 + $0xd0] sm:$0xff]  }
  0x2d   : > { %v1823_v35 = vld [vmem:[%s2168_s21 + $0xd8] sm:$0xff]  }
  0x2f   : > { %1625 = vmatpush3.bf16.msra.mxu0 %v1792_v5 }
  0x30   : > { %1626 = vmatprep.subr.bf16.mxu0 %v1793_v6 }
  0x33   : > { %1627 = vmatpush3.bf16.msra.mxu0 %v1793_v6 }
  0x34   : > { %1628 = vmatprep.subr.bf16.mxu0 %v1794_v7 }
  0x37   : > { %1629 = vmatpush3.bf16.msra.mxu0 %v1794_v7 }
  0x38   : > { %1630 = vmatprep.subr.bf16.mxu0 %v1795_v8 }
  0x3b   : > { %1631 = vmatpush3.bf16.msra.mxu0 %v1795_v8 }
  0x3e   : > { %1633 = vmatmul.mubr.bf16.vlgmr.msra.gmra.mrb[0].mxu0 %v1797_v9 }
  0x3f   : > { %1636 = vmatprep.mubr.bf16.mxu0 %v1798_v10 }
  0x46   : > { %1637 = vmatmul.mubr.bf16.gmra.mrb[4].mxu0 %v1799_v11 }
  0x47   : > { %1640 = vmatprep.mubr.bf16.mxu0 %v1800_v12 }
  0x4e   : > { %1641 = vmatmul.mubr.bf16.gmra.mrb[8].mxu0 %v1801_v13 }
  0x4f   : > { %1644 = vmatprep.mubr.bf16.mxu0 %v1802_v14 }
  0x56   : > { %1645 = vmatmul.mubr.bf16.gmra.mrb[12].mxu0 %v1803_v15 }
  0x57   : > { %1648 = vmatprep.mubr.bf16.mxu0 %v1804_v16 }
  0x5e   : > { %1649 = vmatmul.mubr.bf16.gmra.mrb[16].mxu0 %v1805_v17 }
  0x5f   : > { %1652 = vmatprep.mubr.bf16.mxu0 %v1806_v18 }
  0x66   : > { %1653 = vmatmul.mubr.bf16.gmra.mrb[20].mxu0 %v1807_v19 }
  0x67   : > { %1656 = vmatprep.mubr.bf16.mxu0 %v1808_v20 }
  0x6e   : > { %1657 = vmatmul.mubr.bf16.gmra.mrb[24].mxu0 %v1809_v21 }
  0x6f   : > { %1660 = vmatprep.mubr.bf16.mxu0 %v1810_v22 }
  0x76   : > { %1661 = vmatmul.mubr.bf16.gmra.mrb[28].mxu0 %v1811_v23 }
  0x77   : > { %1664 = vmatprep.mubr.bf16.mxu0 %v1812_v24 }
  0x7e   : > { %1665 = vmatmul.mubr.bf16.gmra.mrb[32].mxu0 %v1813_v25 }
  0x7f   : > { %1668 = vmatprep.mubr.bf16.mxu0 %v1814_v26 }
  0x86   : > { %1669 = vmatmul.mubr.bf16.gmra.mrb[36].mxu0 %v1815_v27 }
  0x87   : > { %1672 = vmatprep.mubr.bf16.mxu0 %v1816_v28 }
  0x8e   : > { %1673 = vmatmul.mubr.bf16.gmra.mrb[40].mxu0 %v1817_v29 }
  0x8f   : > { %1676 = vmatprep.mubr.bf16.mxu0 %v1818_v30 }
  0x96   : > { %1677 = vmatmul.mubr.bf16.gmra.mrb[44].mxu0 %v1819_v31 }
  0x97   : > { %1680 = vmatprep.mubr.bf16.mxu0 %v1820_v32 }
  0x9e   : > { %1681 = vmatmul.mubr.bf16.gmra.mrb[48].mxu0 %v1821_v33 }
  0x9f   : > { %1684 = vmatprep.mubr.bf16.mxu0 %v1822_v34 }
  0xa6   : > { %1685 = vmatmul.mubr.bf16.gmra.mrb[52].mxu0 %v1823_v35 }
 0x111   : > { %v1634_v38 = vpop.f32.mrb[0].mxu0 }
 0x112   : > { %v634_v39 = vadd.f32 %v1634_v38, %v2216_v37  ;;  %v625_v40 = vpop.f32.mrb[1].mxu0 }
 0x113   : > { %v626_v41 = vadd.f32 %v2216_v37, %v625_v40  ;;  %v1635_v42 = vpop.f32.mrb[2].mxu0 }
 0x114   : > { %v850_v43 = vmax.f32 %v634_v39, 1e-06  ;;  %v637_v44 = vadd.f32 %v1635_v42, %v2216_v37  ;;  %v628_v45 = vpop.f32.mrb[3].mxu0 }
 0x115   : > { %v848_v46 = vmax.f32 %v626_v41, 1e-06  ;;  %v629_v47 = vadd.f32 %v2216_v37, %v628_v45 }
 0x116   : > { %1824 = vlog2.f32 %v850_v43  ;;  %v851_v48 = vmax.f32 %v637_v44, 1e-06 }
 0x117   : > { %1826 = vlog2.f32 %v848_v46  ;;  %v849_v49 = vmax.f32 %v629_v47, 1e-06 }
 0x118   : > { %1828 = vlog2.f32 %v851_v48 }
 0x119   : > { %1830 = vlog2.f32 %v849_v49  ;;  %v1638_v50 = vpop.f32.mrb[4].mxu0 }
 0x11a   : > { %v650_v51 = vadd.f32 %v1638_v50, %v2216_v37  ;;  %v641_v52 = vpop.f32.mrb[5].mxu0 }
 0x11b   : > { %v642_v53 = vadd.f32 %v2216_v37, %v641_v52  ;;  %v1639_v54 = vpop.f32.mrb[6].mxu0 }
 0x11c   : > { %v854_v55 = vmax.f32 %v650_v51, 1e-06  ;;  %v653_v56 = vadd.f32 %v1639_v54, %v2216_v37  ;;  %v644_v57 = vpop.f32.mrb[7].mxu0 }
 0x11d   : > { %v852_v58 = vmax.f32 %v642_v53, 1e-06  ;;  %v645_v59 = vadd.f32 %v2216_v37, %v644_v57 }
 0x11e   : > { %1832 = vlog2.f32 %v854_v55  ;;  %v855_v60 = vmax.f32 %v653_v56, 1e-06 }
 0x11f   : > { %1834 = vlog2.f32 %v852_v58  ;;  %v853_v61 = vmax.f32 %v645_v59, 1e-06 }
 0x120   : > { %v1825_v62 = vpop.eup %1824  ;;  %1836 = vlog2.f32 %v855_v60 }
 0x121   : > { %v1827_v0 = vpop.eup %1826  ;;  %v909_v1 = vmul.f32 0.6931472, %v1825_v62  ;;  %1838 = vlog2.f32 %v853_v61  ;;  %v1642_v2 = vpop.f32.mrb[8].mxu0 }
 0x122   : > { %v1829_v3 = vpop.eup %1828  ;;  %v905_v4 = vmul.f32 0.6931472, %v1827_v0  ;;  %v666_v5 = vadd.f32 %v1642_v2, %v2216_v37  ;;  %v657_v6 = vpop.f32.mrb[9].mxu0 }
 0x123   : > { %v1831_v7 = vpop.eup %1830  ;;  %v1019_v8 = vmul.f32 %v2226_v63, %v909_v1  ;;  %v911_v9 = vmul.f32 0.6931472, %v1829_v3  ;;  %v658_v10 = vadd.f32 %v2216_v37, %v657_v6  ;;  %v1643_v11 = vpop.f32.mrb[10].mxu0 }
 0x124   : > { %v1017_v12 = vmul.f32 %v2226_v63, %v905_v4  ;;  %v907_v13 = vmul.f32 0.6931472, %v1831_v7  ;;  %v858_v14 = vmax.f32 %v666_v5, 1e-06  ;;  %v669_v15 = vadd.f32 %v1643_v11, %v2216_v37  ;;  %v660_v16 = vpop.f32.mrb[11].mxu0 }
 0x125   : > { %v1077_v17 = vmul.f32 1.442695, %v1019_v8  ;;  %v1020_v18 = vmul.f32 %v2226_v63, %v911_v9  ;;  %v661_v19 = vadd.f32 %v2216_v37, %v660_v16  ;;  %v856_v23 = vmax.f32 %v658_v10, 1e-06 }
 0x126   : > { %v1073_v20 = vmul.f32 1.442695, %v1017_v12  ;;  %v1018_v21 = vmul.f32 %v2226_v63, %v907_v13  ;;  %1840 = vlog2.f32 %v858_v14  ;;  %v859_v26 = vmax.f32 %v669_v15, 1e-06 }
 0x127   : > { %1842 = vpow2.f32 %v1077_v17  ;;  %v1079_v22 = vmul.f32 1.442695, %v1020_v18  ;;  %v857_v29 = vmax.f32 %v661_v19, 1e-06 }
 0x128   : > { %v1833_v24 = vpop.eup %1832  ;;  %1844 = vpow2.f32 %v1073_v20  ;;  %v1075_v25 = vmul.f32 1.442695, %v1018_v21 }
 0x129   : > { %v1835_v27 = vpop.eup %1834  ;;  %1846 = vpow2.f32 %v1079_v22  ;;  %v917_v28 = vmul.f32 0.6931472, %v1833_v24  ;;  %v1646_v30 = vpop.f32.mrb[12].mxu0 }
 0x12a   : > { %v1837_v31 = vpop.eup %1836  ;;  %1848 = vpow2.f32 %v1075_v25  ;;  %v913_v32 = vmul.f32 0.6931472, %v1835_v27  ;;  %v682_v33 = vadd.f32 %v1646_v30, %v2216_v37  ;;  %v673_v34 = vpop.f32.mrb[13].mxu0 }
 0x12b   : > { %v1839_v35 = vpop.eup %1838  ;;  %v1023_v36 = vmul.f32 %v2226_v63, %v917_v28  ;;  %v919_v38 = vmul.f32 0.6931472, %v1837_v31  ;;  %1850 = vlog2.f32 %v856_v23  ;;  %v674_v39 = vadd.f32 %v2216_v37, %v673_v34  ;;  %v1647_v40 = vpop.f32.mrb[14].mxu0 }
 0x12c   : > { %v1021_v41 = vmul.f32 %v2226_v63, %v913_v32  ;;  %v915_v42 = vmul.f32 0.6931472, %v1839_v35  ;;  %1852 = vlog2.f32 %v859_v26  ;;  %v862_v43 = vmax.f32 %v682_v33, 1e-06  ;;  %v676_v44 = vpop.f32.mrb[15].mxu0 }
 0x12d   : > { %v1085_v45 = vmul.f32 1.442695, %v1023_v36  ;;  %v1024_v46 = vmul.f32 %v2226_v63, %v919_v38  ;;  %1854 = vlog2.f32 %v857_v29  ;;  %v685_v49 = vadd.f32 %v1647_v40, %v2216_v37 }
 0x12e   : > { %v1081_v47 = vmul.f32 1.442695, %v1021_v41  ;;  %v1022_v48 = vmul.f32 %v2226_v63, %v915_v42  ;;  %1856 = vlog2.f32 %v862_v43  ;;  %v860_v51 = vmax.f32 %v674_v39, 1e-06 }
 0x12f   : > { %1858 = vpow2.f32 %v1085_v45  ;;  %v1087_v50 = vmul.f32 1.442695, %v1024_v46  ;;  %v677_v52 = vadd.f32 %v2216_v37, %v676_v44  ;;  %v863_v55 = vmax.f32 %v685_v49, 1e-06 }
 0x130   : > { %v1841_v53 = vpop.eup %1840  ;;  %1860 = vpow2.f32 %v1081_v47  ;;  %v1083_v54 = vmul.f32 1.442695, %v1022_v48 }
 0x131   : > { %v2244_v56 = vpop.eup %1842  ;;  %1862 = vpow2.f32 %v1087_v50  ;;  %v925_v57 = vmul.f32 0.6931472, %v1841_v53  ;;  %v861_v58 = vmax.f32 %v677_v52, 1e-06  ;;  %v1650_v59 = vpop.f32.mrb[16].mxu0 }
 0x132   : > { %v2246_v60 = vpop.eup %1844  ;;  %1864 = vpow2.f32 %v1083_v54  ;;  %v698_v61 = vadd.f32 %v1650_v59, %v2216_v37  ;;  %v689_v62 = vpop.f32.mrb[17].mxu0 }
 0x133   : > { %v2249_v0 = vpop.eup %1846  ;;  %v1027_v1 = vmul.f32 %v2226_v63, %v925_v57  ;;  %1866 = vlog2.f32 %v860_v51  ;;  %v690_v2 = vadd.f32 %v2216_v37, %v689_v62  ;;  %v1651_v3 = vpop.f32.mrb[18].mxu0 }
 0x134   : > { %v2253_v4 = vpop.eup %1848  ;;  %1868 = vlog2.f32 %v863_v55  ;;  %v866_v5 = vmax.f32 %v698_v61, 1e-06  ;;  %v701_v6 = vadd.f32 %v1651_v3, %v2216_v37  ;;  %v692_v7 = vpop.f32.mrb[19].mxu0  ;;  %v1701_v8 = vpack.c.bf16 %v2249_v0, %v2244_v56 }
 0x135   : > { %v1851_v9 = vpop.eup %1850  ;;  %1870 = vlog2.f32 %v861_v58  ;;  %v864_v10 = vmax.f32 %v690_v2, 1e-06  ;;  %v693_v11 = vadd.f32 %v2216_v37, %v692_v7  ;;  %v1697_v15 = vpack.c.bf16 %v2253_v4, %v2246_v60 }
 0x136   : > { %v1853_v12 = vpop.eup %1852  ;;  %v921_v13 = vmul.f32 0.6931472, %v1851_v9  ;;  %1872 = vlog2.f32 %v866_v5  ;;  %v867_v14 = vmax.f32 %v701_v6, 1e-06  ;;  %v1093_v17 = vmul.f32 1.442695, %v1027_v1 }
 0x137   : > { %v1855_v16 = vpop.eup %1854  ;;  %v927_v18 = vmul.f32 0.6931472, %v1853_v12  ;;  %v865_v19 = vmax.f32 %v693_v11, 1e-06  ;;  %1874 = vlog2.f32 %v864_v10 }
 0x138   : > { %v1857_v20 = vpop.eup %1856  ;;  %v1025_v21 = vmul.f32 %v2226_v63, %v921_v13  ;;  %v923_v22 = vmul.f32 0.6931472, %v1855_v16  ;;  %1876 = vlog2.f32 %v867_v14 }
 0x139   : > { %v2262_v23 = vpop.eup %1858  ;;  %v1028_v24 = vmul.f32 %v2226_v63, %v927_v18  ;;  %v933_v25 = vmul.f32 0.6931472, %v1857_v20  ;;  %v1654_v26 = vpop.f32.mrb[20].mxu0  ;;  %1878 = vlog2.f32 %v865_v19 }
 0x13a   : > { %v2265_v27 = vpop.eup %1860  ;;  %v1089_v28 = vmul.f32 1.442695, %v1025_v21  ;;  %v1026_v29 = vmul.f32 %v2226_v63, %v923_v22  ;;  %v714_v30 = vadd.f32 %v1654_v26, %v2216_v37  ;;  %v705_v31 = vpop.f32.mrb[21].mxu0  ;;  %1880 = vpow2.f32 %v1093_v17 }
 0x13b   : > { %v2269_v32 = vpop.eup %1862  ;;  %v1095_v33 = vmul.f32 1.442695, %v1028_v24  ;;  %v1031_v34 = vmul.f32 %v2226_v63, %v933_v25  ;;  %v706_v35 = vadd.f32 %v2216_v37, %v705_v31  ;;  %v1655_v36 = vpop.f32.mrb[22].mxu0 }
 0x13c   : > { %v2273_v38 = vpop.eup %1864  ;;  %1882 = vpow2.f32 %v1089_v28  ;;  %v1091_v39 = vmul.f32 1.442695, %v1026_v29  ;;  %v870_v40 = vmax.f32 %v714_v30, 1e-06  ;;  %v717_v41 = vadd.f32 %v1655_v36, %v2216_v37  ;;  %v708_v42 = vpop.f32.mrb[23].mxu0 }
 0x13d   : > { %v1867_v43 = vpop.eup %1866  ;;  %1884 = vpow2.f32 %v1095_v33  ;;  %v1101_v44 = vmul.f32 1.442695, %v1031_v34  ;;  %v868_v45 = vmax.f32 %v706_v35, 1e-06  ;;  %v709_v46 = vadd.f32 %v2216_v37, %v708_v42 }
 0x13e   : > { %v1869_v47 = vpop.eup %1868  ;;  %1886 = vpow2.f32 %v1091_v39  ;;  %v929_v48 = vmul.f32 0.6931472, %v1867_v43  ;;  %v871_v49 = vmax.f32 %v717_v41, 1e-06  ;;  %v1705_v50 = vpack.c.bf16 %v2273_v38, %v2265_v27 }
 0x13f   : > { %v1871_v51 = vpop.eup %1870  ;;  %1888 = vpow2.f32 %v1101_v44  ;;  %v935_v52 = vmul.f32 0.6931472, %v1869_v47  ;;  %v869_v53 = vmax.f32 %v709_v46, 1e-06  ;;  %v1709_v54 = vpack.c.bf16 %v2269_v32, %v2262_v23 }
 0x140   : > { %v1873_v55 = vpop.eup %1872  ;;  %v1029_v57 = vmul.f32 %v2226_v63, %v929_v48  ;;  %v931_v58 = vmul.f32 0.6931472, %v1871_v51  ;;  %1890 = vlog2.f32 %v870_v40 }
 0x141   : > { %v1032_v59 = vmul.f32 %v2226_v63, %v935_v52  ;;  %v941_v61 = vmul.f32 0.6931472, %v1873_v55  ;;  %1892 = vlog2.f32 %v868_v45  ;;  %v1658_v62 = vpop.f32.mrb[24].mxu0  ;;  %v1875_v1 = vpop.eup %1874 }
 0x142   : > { %v1097_v2 = vmul.f32 1.442695, %v1029_v57  ;;  %v1030_v3 = vmul.f32 %v2226_v63, %v931_v58  ;;  %1894 = vlog2.f32 %v871_v49  ;;  %v730_v5 = vadd.f32 %v1658_v62, %v2216_v37  ;;  %v721_v6 = vpop.f32.mrb[25].mxu0  ;;  %v1877_v7 = vpop.eup %1876 }
 0x143   : > { %v1103_v9 = vmul.f32 1.442695, %v1032_v59  ;;  %v1035_v10 = vmul.f32 %v2226_v63, %v941_v61  ;;  %v937_v11 = vmul.f32 0.6931472, %v1875_v1  ;;  %1896 = vlog2.f32 %v869_v53  ;;  %v1659_v12 = vpop.f32.mrb[26].mxu0  ;;  %v1879_v13 = vpop.eup %1878 }
 0x144   : > { %1898 = vpow2.f32 %v1097_v2  ;;  %v1099_v14 = vmul.f32 1.442695, %v1030_v3  ;;  %v943_v16 = vmul.f32 0.6931472, %v1877_v7  ;;  %v874_v17 = vmax.f32 %v730_v5, 1e-06  ;;  %v2286_v18 = vpop.eup %1880 }
 0x145   : > { %1900 = vpow2.f32 %v1103_v9  ;;  %v1109_v19 = vmul.f32 1.442695, %v1035_v10  ;;  %v1033_v20 = vmul.f32 %v2226_v63, %v937_v11  ;;  %v939_v21 = vmul.f32 0.6931472, %v1879_v13  ;;  %v724_v22 = vpop.f32.mrb[27].mxu0 }
 0x146   : > { %v2289_v24 = vpop.eup %1882  ;;  %1902 = vpow2.f32 %v1099_v14  ;;  %v1036_v25 = vmul.f32 %v2226_v63, %v943_v16  ;;  %v722_v26 = vadd.f32 %v2216_v37, %v721_v6  ;;  %v733_v28 = vadd.f32 %v1659_v12, %v2216_v37 }
 0x147   : > { %v2294_v29 = vpop.eup %1884  ;;  %1904 = vpow2.f32 %v1109_v19  ;;  %v1105_v30 = vmul.f32 1.442695, %v1033_v20  ;;  %v1034_v31 = vmul.f32 %v2226_v63, %v939_v21  ;;  %v725_v33 = vadd.f32 %v2216_v37, %v724_v22 }
 0x148   : > { %v2298_v34 = vpop.eup %1886  ;;  %v1111_v35 = vmul.f32 1.442695, %v1036_v25  ;;  %1906 = vlog2.f32 %v874_v17  ;;  %v872_v36 = vmax.f32 %v722_v26, 1e-06  ;;  %v875_v41 = vmax.f32 %v733_v28, 1e-06 }
 0x149   : > { %v2300_v39 = vpop.eup %1888  ;;  %1908 = vpow2.f32 %v1105_v30  ;;  %v1107_v40 = vmul.f32 1.442695, %v1034_v31  ;;  %v1662_v42 = vpop.f32.mrb[28].mxu0  ;;  %v1713_v43 = vpack.c.bf16 %v2298_v34, %v2289_v24  ;;  %v873_v45 = vmax.f32 %v725_v33, 1e-06 }
 0x14a   : > { %v1891_v44 = vpop.eup %1890  ;;  %1910 = vpow2.f32 %v1111_v35  ;;  %v746_v46 = vadd.f32 %v1662_v42, %v2216_v37  ;;  %v737_v47 = vpop.f32.mrb[29].mxu0  ;;  %v1717_v48 = vpack.c.bf16 %v2294_v29, %v2286_v18 }
 0x14b   : > { %v1893_v49 = vpop.eup %1892  ;;  %1912 = vpow2.f32 %v1107_v40  ;;  %v949_v51 = vmul.f32 0.6931472, %v1891_v44  ;;  %v738_v52 = vadd.f32 %v2216_v37, %v737_v47  ;;  %v1663_v53 = vpop.f32.mrb[30].mxu0 }
 0x14c   : > { %v1895_v55 = vpop.eup %1894  ;;  %v945_v57 = vmul.f32 0.6931472, %v1893_v49  ;;  %1914 = vlog2.f32 %v872_v36  ;;  %v878_v58 = vmax.f32 %v746_v46, 1e-06  ;;  %v749_v59 = vadd.f32 %v1663_v53, %v2216_v37  ;;  %v740_v61 = vpop.f32.mrb[31].mxu0 }
 0x14d   : > { %v1897_v62 = vpop.eup %1896  ;;  %v1039_v1 = vmul.f32 %v2226_v63, %v949_v51  ;;  %v951_v2 = vmul.f32 0.6931472, %v1895_v55  ;;  %1916 = vlog2.f32 %v875_v41  ;;  %v876_v3 = vmax.f32 %v738_v52, 1e-06 }
 0x14e   : > { %v2310_v5 = vpop.eup %1898  ;;  %v1037_v6 = vmul.f32 %v2226_v63, %v945_v57  ;;  %v947_v7 = vmul.f32 0.6931472, %v1897_v62  ;;  %1918 = vlog2.f32 %v873_v45  ;;  %v741_v12 = vadd.f32 %v2216_v37, %v740_v61 }
 0x14f   : > { %v2313_v9 = vpop.eup %1900  ;;  %v1117_v10 = vmul.f32 1.442695, %v1039_v1  ;;  %v1040_v11 = vmul.f32 %v2226_v63, %v951_v2  ;;  %1920 = vlog2.f32 %v878_v58  ;;  %v879_v21 = vmax.f32 %v749_v59, 1e-06 }
 0x150   : > { %v2317_v13 = vpop.eup %1902  ;;  %v1113_v14 = vmul.f32 1.442695, %v1037_v6  ;;  %v1038_v16 = vmul.f32 %v2226_v63, %v947_v7  ;;  %1922 = vlog2.f32 %v876_v3  ;;  %v1725_v17 = vpack.c.bf16 %v2313_v9, %v2300_v39 }
 0x151   : > { %v1905_v19 = vpop.eup %1904  ;;  %1924 = vpow2.f32 %v1117_v10  ;;  %v1119_v20 = vmul.f32 1.442695, %v1040_v11  ;;  %v1666_v22 = vpop.f32.mrb[32].mxu0  ;;  %v1721_v25 = vpack.c.bf16 %v2317_v13, %v2310_v5  ;;  %v877_v30 = vmax.f32 %v741_v12, 1e-06 }
 0x152   : > { %v1907_v26 = vpop.eup %1906  ;;  %1926 = vpow2.f32 %v1113_v14  ;;  %v1115_v28 = vmul.f32 1.442695, %v1038_v16  ;;  %v762_v31 = vadd.f32 %v1666_v22, %v2216_v37  ;;  %v753_v33 = vpop.f32.mrb[33].mxu0 }
 0x153   : > { %v1909_v35 = vpop.eup %1908  ;;  %1928 = vpow2.f32 %v1119_v20  ;;  %v957_v36 = vmul.f32 0.6931472, %v1907_v26  ;;  %v754_v40 = vadd.f32 %v2216_v37, %v753_v33  ;;  %v1667_v41 = vpop.f32.mrb[34].mxu0 }
 0x154   : > { %v1911_v42 = vpop.eup %1910  ;;  %1930 = vpow2.f32 %v1115_v28  ;;  %v882_v44 = vmax.f32 %v762_v31, 1e-06  ;;  %v765_v45 = vadd.f32 %v1667_v41, %v2216_v37  ;;  %v756_v46 = vpop.f32.mrb[35].mxu0 }
 0x155   : > { %v1913_v47 = vpop.eup %1912  ;;  %v1043_v49 = vmul.f32 %v2226_v63, %v957_v36  ;;  %1932 = vlog2.f32 %v879_v21  ;;  %v880_v51 = vmax.f32 %v754_v40, 1e-06  ;;  %v757_v52 = vadd.f32 %v2216_v37, %v756_v46 }
 0x156   : > { %v1915_v53 = vpop.eup %1914  ;;  %1934 = vlog2.f32 %v877_v30  ;;  %v883_v55 = vmax.f32 %v765_v45, 1e-06  ;;  %v1695_v57 = vpack.c.bf16 %v1913_v47, %v1909_v35  ;;  %v1699_v58 = vpack.c.bf16 %v1911_v42, %v1905_v19 }
 0x157   : > { %v1917_v59 = vpop.eup %1916  ;;  %v953_v61 = vmul.f32 0.6931472, %v1915_v53  ;;  %1936 = vlog2.f32 %v882_v44  ;;  %v881_v62 = vmax.f32 %v757_v52, 1e-06  ;;  %v1125_v2 = vmul.f32 1.442695, %v1043_v49 }
 0x158   : > { %v1919_v1 = vpop.eup %1918  ;;  %v959_v3 = vmul.f32 0.6931472, %v1917_v59  ;;  %1938 = vlog2.f32 %v880_v51  ;;  %1696 = vmatprep.subr.bf16.mxu1 %v1695_v57 }
 0x159   : > { %v1921_v6 = vpop.eup %1920  ;;  %v1041_v7 = vmul.f32 %v2226_v63, %v953_v61  ;;  %v955_v10 = vmul.f32 0.6931472, %v1919_v1  ;;  %1698 = vmatpush3.bf16.msra.mxu1 %v1697_v15  ;;  %v1670_v11 = vpop.f32.mrb[36].mxu0  ;;  %1940 = vlog2.f32 %v883_v55 }
 0x15a   : > { %v1923_v12 = vpop.eup %1922  ;;  %v1044_v14 = vmul.f32 %v2226_v63, %v959_v3  ;;  %v965_v16 = vmul.f32 0.6931472, %v1921_v6  ;;  %v778_v19 = vadd.f32 %v1670_v11, %v2216_v37  ;;  %1700 = vmatprep.subr.bf16.mxu1 %v1699_v58  ;;  %v769_v20 = vpop.f32.mrb[37].mxu0  ;;  %1942 = vlog2.f32 %v881_v62 }
 0x15b   : > { %v1925_v21 = vpop.eup %1924  ;;  %v1121_v22 = vmul.f32 1.442695, %v1041_v7  ;;  %v1042_v26 = vmul.f32 %v2226_v63, %v955_v10  ;;  %v961_v28 = vmul.f32 0.6931472, %v1923_v12  ;;  %v1671_v30 = vpop.f32.mrb[38].mxu0  ;;  %1944 = vpow2.f32 %v1125_v2 }
 0x15c   : > { %v1927_v31 = vpop.eup %1926  ;;  %v1127_v60 = vmul.f32 1.442695, %v1044_v14  ;;  %v1047_v4 = vmul.f32 %v2226_v63, %v965_v16  ;;  %v770_v15 = vadd.f32 %v2216_v37, %v769_v20  ;;  %v772_v33 = vpop.f32.mrb[39].mxu0  ;;  %v781_v41 = vadd.f32 %v1671_v30, %v2216_v37 }
 0x15d   : > { %v1929_v35 = vpop.eup %1928  ;;  %1946 = vpow2.f32 %v1121_v22  ;;  %v1123_v36 = vmul.f32 1.442695, %v1042_v26  ;;  %v1045_v40 = vmul.f32 %v2226_v63, %v961_v28  ;;  %1702 = vmatpush3.bf16.msra.mxu1 %v1701_v8  ;;  %v886_v45 = vmax.f32 %v778_v19, 1e-06 }
 0x15e   : > { %v1931_v42 = vpop.eup %1930  ;;  %1948 = vpow2.f32 %v1127_v60  ;;  %v1133_v44 = vmul.f32 1.442695, %v1047_v4  ;;  %v773_v46 = vadd.f32 %v2216_v37, %v772_v33  ;;  %v884_v51 = vmax.f32 %v770_v15, 1e-06 }
 0x15f   : > { %v1933_v47 = vpop.eup %1932  ;;  %1950 = vpow2.f32 %v1123_v36  ;;  %v1129_v49 = vmul.f32 1.442695, %v1045_v40  ;;  %v1703_v52 = vpack.c.bf16 %v1931_v42, %v1927_v31  ;;  %v887_v57 = vmax.f32 %v781_v41, 1e-06 }
 0x160   : > { %v1935_v53 = vpop.eup %1934  ;;  %1952 = vpow2.f32 %v1133_v44  ;;  %v967_v55 = vmul.f32 0.6931472, %v1933_v47  ;;  %v1707_v58 = vpack.c.bf16 %v1929_v35, %v1925_v21  ;;  %v885_v0 = vmax.f32 %v773_v46, 1e-06 }
 0x161   : > { %v1937_v59 = vpop.eup %1936  ;;  %1954 = vpow2.f32 %v1129_v49  ;;  %v963_v56 = vmul.f32 0.6931472, %v1935_v53  ;;  %1704 = vmatprep.subr.bf16.mxu1 %v1703_v52  ;;  %v1674_v8 = vpop.f32.mrb[40].mxu0 }
 0x162   : > { %v1939_v61 = vpop.eup %1938  ;;  %v1048_v62 = vmul.f32 %v2226_v63, %v967_v55  ;;  %v973_v1 = vmul.f32 0.6931472, %v1937_v59  ;;  %1956 = vlog2.f32 %v886_v45  ;;  %1706 = vmatpush3.bf16.msra.mxu1 %v1705_v50  ;;  %v794_v2 = vadd.f32 %v1674_v8, %v2216_v37  ;;  %v785_v3 = vpop.f32.mrb[41].mxu0 }
 0x163   : > { %v1046_v6 = vmul.f32 %v2226_v63, %v963_v56  ;;  %v969_v7 = vmul.f32 0.6931472, %v1939_v61  ;;  %1958 = vlog2.f32 %v884_v51  ;;  %1708 = vmatprep.subr.bf16.mxu1 %v1707_v58  ;;  %v1675_v10 = vpop.f32.mrb[42].mxu0  ;;  %v1941_v11 = vpop.eup %1940  ;;  %v786_v16 = vadd.f32 %v2216_v37, %v785_v3 }
 0x164   : > { %v1135_v12 = vmul.f32 1.442695, %v1048_v62  ;;  %v1051_v14 = vmul.f32 %v2226_v63, %v973_v1  ;;  %1960 = vlog2.f32 %v887_v57  ;;  %v788_v19 = vpop.f32.mrb[43].mxu0  ;;  %v1943_v20 = vpop.eup %1942  ;;  %v975_v50 = vmul.f32 0.6931472, %v1941_v11 }
 0x165   : > { %v1131_v27 = vmul.f32 1.442695, %v1046_v6  ;;  %v1049_v38 = vmul.f32 %v2226_v63, %v969_v7  ;;  %1962 = vlog2.f32 %v885_v0  ;;  %v1945_v21 = vpop.eup %1944  ;;  %v971_v26 = vmul.f32 0.6931472, %v1943_v20 }
 0x166   : > { %1964 = vpow2.f32 %v1135_v12  ;;  %v1141_v22 = vmul.f32 1.442695, %v1051_v14  ;;  %v890_v28 = vmax.f32 %v794_v2, 1e-06  ;;  %1710 = vmatpush3.bf16.msra.mxu1 %v1709_v54  ;;  %v1052_v60 = vmul.f32 %v2226_v63, %v975_v50 }
 0x167   : > { %v1947_v30 = vpop.eup %1946  ;;  %1966 = vpow2.f32 %v1131_v27  ;;  %v1137_v31 = vmul.f32 1.442695, %v1049_v38  ;;  %v797_v4 = vadd.f32 %v1675_v10, %v2216_v37  ;;  %v1050_v33 = vmul.f32 %v2226_v63, %v971_v26 }
 0x168   : > { %v1949_v15 = vpop.eup %1948  ;;  %1968 = vpow2.f32 %v1141_v22  ;;  %v789_v35 = vadd.f32 %v2216_v37, %v788_v19  ;;  %v1143_v40 = vmul.f32 1.442695, %v1052_v60  ;;  %v888_v41 = vmax.f32 %v786_v16, 1e-06 }
 0x169   : > { %v1951_v36 = vpop.eup %1950  ;;  %1970 = vpow2.f32 %v1137_v31  ;;  %v1678_v42 = vpop.f32.mrb[44].mxu0  ;;  %v1715_v23 = vpack.c.bf16 %v1949_v15, %v1945_v21  ;;  %v1139_v54 = vmul.f32 1.442695, %v1050_v33  ;;  %v891_v44 = vmax.f32 %v797_v4, 1e-06 }
 0x16a   : > { %v2360_v32 = vpop.eup %1952  ;;  %1972 = vlog2.f32 %v890_v28  ;;  %v1711_v45 = vpack.c.bf16 %v1951_v36, %v1947_v30  ;;  %v801_v46 = vpop.f32.mrb[45].mxu0  ;;  %v889_v49 = vmax.f32 %v789_v35, 1e-06  ;;  %v810_v51 = vadd.f32 %v1678_v42, %v2216_v37 }
 0x16b   : > { %v1955_v47 = vpop.eup %1954  ;;  %1974 = vpow2.f32 %v1143_v40  ;;  %v802_v52 = vadd.f32 %v2216_v37, %v801_v46  ;;  %v1679_v53 = vpop.f32.mrb[46].mxu0 }
 0x16c   : > { %v1957_v55 = vpop.eup %1956  ;;  %1976 = vpow2.f32 %v1139_v54  ;;  %1712 = vmatprep.subr.bf16.mxu1 %v1711_v45  ;;  %v813_v57 = vadd.f32 %v1679_v53, %v2216_v37  ;;  %v804_v58 = vpop.f32.mrb[47].mxu0  ;;  %v894_v0 = vmax.f32 %v810_v51, 1e-06 }
 0x16d   : > { %v1959_v59 = vpop.eup %1958  ;;  %v981_v56 = vmul.f32 0.6931472, %v1957_v55  ;;  %1978 = vlog2.f32 %v888_v41  ;;  %1714 = vmatpush3.bf16.msra.mxu1 %v1713_v43  ;;  %v892_v8 = vmax.f32 %v802_v52, 1e-06  ;;  %v805_v2 = vadd.f32 %v2216_v37, %v804_v58 }
 0x16e   : > { %v1961_v61 = vpop.eup %1960  ;;  %v977_v62 = vmul.f32 0.6931472, %v1959_v59  ;;  %1980 = vlog2.f32 %v891_v44  ;;  %1716 = vmatprep.subr.bf16.mxu1 %v1715_v23  ;;  %v895_v1 = vmax.f32 %v813_v57, 1e-06  ;;  %v2081_v55 = vmov 0.0|0.0   ;;  %v1188_v59 = vld [vmem:[%s2464_s2 + $0x18] sm:$0xff] }
 0x16f   : > { %v1963_v3 = vpop.eup %1962  ;;  %v1055_v6 = vmul.f32 %v2226_v63, %v981_v56  ;;  %v983_v7 = vmul.f32 0.6931472, %v1961_v61  ;;  %1982 = vlog2.f32 %v889_v49  ;;  %v893_v24 = vmax.f32 %v805_v2, 1e-06 }
 0x170   : > { %v1965_v10 = vpop.eup %1964  ;;  %v1053_v11 = vmul.f32 %v2226_v63, %v977_v62  ;;  %v979_v12 = vmul.f32 0.6931472, %v1963_v3  ;;  %1984 = vlog2.f32 %v894_v0 }
 0x171   : > { %v1967_v34 = vpop.eup %1966  ;;  %v1149_v43 = vmul.f32 1.442695, %v1055_v6  ;;  %v1056_v14 = vmul.f32 %v2226_v63, %v983_v7  ;;  %1986 = vlog2.f32 %v892_v8  ;;  %1718 = vmatpush3.bf16.msra.mxu1 %v1717_v48  ;;  %v1682_v16 = vpop.f32.mrb[48].mxu0  ;;  %v1723_v19 = vpack.c.bf16 %v1965_v10, %v2360_v32  ;;  %v2052_v7 = vld [vmem:[%s2466_s4] ss:$0 sm:$0xff] }
 0x172   : > { %v2376_v20 = vpop.eup %1968  ;;  %v1145_v27 = vmul.f32 1.442695, %v1053_v11  ;;  %v1054_v38 = vmul.f32 %v2226_v63, %v979_v12  ;;  %1988 = vlog2.f32 %v895_v1  ;;  %v1719_v50 = vpack.c.bf16 %v1967_v34, %v1955_v47  ;;  %v817_v21 = vpop.f32.mrb[49].mxu0 }
 0x173   : > { %v2379_v22 = vpop.eup %1970  ;;  %1990 = vpow2.f32 %v1149_v43  ;;  %v1151_v26 = vmul.f32 1.442695, %v1056_v14  ;;  %v826_v28 = vadd.f32 %v1682_v16, %v2216_v37  ;;  %v818_v18 = vadd.f32 %v2216_v37, %v817_v21  ;;  %v1683_v29 = vpop.f32.mrb[50].mxu0 }
 0x174   : > { %v1973_v48 = vpop.eup %1972  ;;  %1992 = vpow2.f32 %v1145_v27  ;;  %v1147_v30 = vmul.f32 1.442695, %v1054_v38  ;;  %1720 = vmatprep.subr.bf16.mxu1 %v1719_v50  ;;  %v829_v31 = vadd.f32 %v1683_v29, %v2216_v37  ;;  %v820_v60 = vpop.f32.mrb[51].mxu0 }
 0x175   : > { %v2384_v4 = vpop.eup %1974  ;;  %1994 = vpow2.f32 %v1151_v26  ;;  %v989_v15 = vmul.f32 0.6931472, %v1973_v48  ;;  %1722 = vmatpush3.bf16.msra.mxu1 %v1721_v25  ;;  %v898_v33 = vmax.f32 %v826_v28, 1e-06  ;;  %v896_v35 = vmax.f32 %v818_v18, 1e-06 }
 0x176   : > { %v1977_v36 = vpop.eup %1976  ;;  %1996 = vpow2.f32 %v1147_v30  ;;  %1724 = vmatprep.subr.bf16.mxu1 %v1723_v19  ;;  %v899_v40 = vmax.f32 %v829_v31, 1e-06  ;;  %v821_v41 = vadd.f32 %v2216_v37, %v820_v60  ;;  %v1731_v42 = vpack.c.bf16 %v2384_v4, %v2376_v20  ;;  %v1185_v25 = vld [vmem:[%s2464_s2] sm:$0xff] }
 0x177   : > { %v1979_v23 = vpop.eup %1978  ;;  %v1059_v32 = vmul.f32 %v2226_v63, %v989_v15  ;;  %1998 = vlog2.f32 %v893_v24  ;;  %v1728_v54 = vpack.c.bf16 %v1977_v36, %v2379_v22 }
 0x178   : > { %v1981_v44 = vpop.eup %1980  ;;  %v985_v5 = vmul.f32 0.6931472, %v1979_v23  ;;  %2000 = vlog2.f32 %v898_v33  ;;  %v897_v13 = vmax.f32 %v821_v41, 1e-06 }
 0x179   : > { %v1983_v45 = vpop.eup %1982  ;;  %v1157_v46 = vmul.f32 1.442695, %v1059_v32  ;;  %v991_v47 = vmul.f32 0.6931472, %v1981_v44  ;;  %2002 = vlog2.f32 %v896_v35  ;;  %1726 = vmatpush3.bf16.msra.mxu1 %v1725_v17  ;;  %v1686_v49 = vpop.f32.mrb[52].mxu0 }
 0x17a   : > { %v1985_v51 = vpop.eup %1984  ;;  %v1057_v52 = vmul.f32 %v2226_v63, %v985_v5  ;;  %v987_v53 = vmul.f32 0.6931472, %v1983_v45  ;;  %2004 = vlog2.f32 %v899_v40  ;;  %1727 = vmatprep.subr.bf16.mxu1 %v2081_v55  ;;  %v842_v57 = vadd.f32 %v1686_v49, %v2216_v37  ;;  %v833_v58 = vpop.f32.mrb[53].mxu0 }
 0x17b   : > { %v1987_v56 = vpop.eup %1986  ;;  %2006 = vpow2.f32 %v1157_v46  ;;  %v1060_v39 = vmul.f32 %v2226_v63, %v991_v47  ;;  %v997_v9 = vmul.f32 0.6931472, %v1985_v51  ;;  %v1687_v17 = vpop.f32.mrb[54].mxu0  ;;  %v834_v10 = vadd.f32 %v2052_v7, %v833_v58 }
 0x17c   : > { %v1989_v0 = vpop.eup %1988  ;;  %v1153_v8 = vmul.f32 1.442695, %v1057_v52  ;;  %v1058_v61 = vmul.f32 %v2226_v63, %v987_v53  ;;  %v993_v62 = vmul.f32 0.6931472, %v1987_v56  ;;  %2008 = vlog2.f32 %v897_v13  ;;  %1258 = vmatmul.mubr.f32.vlgmr.msra.gmra.mrb[0].mxu1 %v1185_v25  ;;  %v836_v1 = vpop.f32.mrb[55].mxu0 }
 0x17d   : > { %v2408_v37 = vpop.eup %1990  ;;  %v1159_v2 = vmul.f32 1.442695, %v1060_v39  ;;  %v1063_v3 = vmul.f32 %v2226_v63, %v997_v9  ;;  %v999_v6 = vmul.f32 0.6931472, %v1989_v0  ;;  %1729 = vmatpush1.bf16.msra.mxu1 %v1728_v54  ;;  %1537 = vmatprep.mubr.msk.f32.mxu1 %vm1189_vm0, %v1188_v59  ;;  %v902_v34 = vmax.f32 %v842_v57, 1e-06 }
 0x17e   : > { %v1993_v11 = vpop.eup %1992  ;;  %2010 = vpow2.f32 %v1153_v8  ;;  %v1155_v12 = vmul.f32 1.442695, %v1058_v61  ;;  %v1061_v24 = vmul.f32 %v2226_v63, %v993_v62  ;;  %1730 = vmatprep.subr.bf16.mxu1 %v2081_v55  ;;  %v845_v19 = vadd.f32 %v2052_v7, %v1687_v17 }
 0x17f   : > { %v1995_v43 = vpop.eup %1994  ;;  %2012 = vpow2.f32 %v1159_v2  ;;  %v1165_v14 = vmul.f32 1.442695, %v1063_v3  ;;  %v1064_v16 = vmul.f32 %v2226_v63, %v999_v6  ;;  %v837_v50 = vadd.f32 %v2052_v7, %v836_v1 }
 0x180   : > { %v1997_v27 = vpop.eup %1996  ;;  %2014 = vpow2.f32 %v1155_v12  ;;  %v1161_v38 = vmul.f32 1.442695, %v1061_v24  ;;  %v1737_v21 = vpack.c.bf16 %v1995_v43, %v2408_v37  ;;  %v900_v28 = vmax.f32 %v834_v10, 1e-06 }
 0x181   : > { %v1999_v22 = vpop.eup %1998  ;;  %2016 = vpow2.f32 %v1165_v14  ;;  %v1167_v26 = vmul.f32 1.442695, %v1064_v16  ;;  %1732 = vmatpush1.bf16.msra.mxu1 %v1731_v42  ;;  %v1734_v18 = vpack.c.bf16 %v1997_v27, %v1993_v11  ;;  %v903_v30 = vmax.f32 %v845_v19, 1e-06 }
 0x182   : > { %v2001_v29 = vpop.eup %2000  ;;  %2018 = vpow2.f32 %v1161_v38  ;;  %v995_v48 = vmul.f32 0.6931472, %v1999_v22  ;;  %1733 = vmatprep.subr.bf16.mxu1 %v2081_v55  ;;  %v901_v15 = vmax.f32 %v837_v50, 1e-06 }
 0x183   : > { %v2003_v31 = vpop.eup %2002  ;;  %2020 = vpow2.f32 %v1167_v26  ;;  %v1005_v60 = vmul.f32 0.6931472, %v2001_v29  ;;  %v1341_v29 = vld [vmem:[%s2467_s5 + $0x8] sm:$0xff] }
 0x184   : > { %v2005_v33 = vpop.eup %2004  ;;  %v1062_v35 = vmul.f32 %v2226_v63, %v995_v48  ;;  %v1001_v36 = vmul.f32 0.6931472, %v2003_v31  ;;  %2022 = vlog2.f32 %v902_v34 }
 0x185   : > { %v2007_v40 = vpop.eup %2006  ;;  %v1067_v20 = vmul.f32 %v2226_v63, %v1005_v60  ;;  %v1007_v4 = vmul.f32 0.6931472, %v2005_v33  ;;  %2024 = vlog2.f32 %v900_v28  ;;  %1735 = vmatpush1.bf16.msra.mxu1 %v1734_v18  ;;  %v1187_v28 = vld [vmem:[%s2464_s2 + $0x10] sm:$0xff]  ;;  %v1340_v18 = vld [vmem:[%s2467_s5] sm:$0xff] }
 0x186   : > { %v2009_v41 = vpop.eup %2008  ;;  %v1163_v42 = vmul.f32 1.442695, %v1062_v35  ;;  %v1065_v23 = vmul.f32 %v2226_v63, %v1001_v36  ;;  %2026 = vlog2.f32 %v903_v30  ;;  %1736 = vmatprep.subr.bf16.mxu1 %v2081_v55  ;;  %v1764_v48 = vpack.c.bf16 %v1341_v29, %v1340_v18 }
 0x187   : > { %v1173_v32 = vmul.f32 1.442695, %v1067_v20  ;;  %v1068_v54 = vmul.f32 %v2226_v63, %v1007_v4  ;;  %v1003_v44 = vmul.f32 0.6931472, %v2009_v41  ;;  %2028 = vlog2.f32 %v901_v15 }
 0x188   : > { %v2011_v5 = vpop.eup %2010  ;;  %2030 = vpow2.f32 %v1163_v42  ;;  %v1169_v13 = vmul.f32 1.442695, %v1065_v23  ;;  %v2083_v30 = vmov 0.0  }
 0x189   : > { %v2013_v25 = vpop.eup %2012  ;;  %2032 = vpow2.f32 %v1173_v32  ;;  %v1175_v45 = vmul.f32 1.442695, %v1068_v54  ;;  %v1066_v46 = vmul.f32 %v2226_v63, %v1003_v44  ;;  %1738 = vmatpush1.bf16.msra.mxu1 %v1737_v21  ;;  %v1538_v32 = vld [vmem:[%s2468_s6] ss:$0 sm:$0xff] }
 0x18a   : > { %v2015_v47 = vpop.eup %2014  ;;  %1739 = vmatprep.subr.bf16.mxu1 %v2081_v55  ;;  %v1743_v49 = vpack.c.bf16 %v2013_v25, %v2007_v40  ;;  %v1335_v40 = vstv %s1499_s28 }
 0x18b   : > { %v2017_v51 = vpop.eup %2016  ;;  %2034 = vpow2.f32 %v1175_v45  ;;  %v1171_v52 = vmul.f32 1.442695, %v1066_v46  ;;  %v1740_v53 = vpack.c.bf16 %v2015_v47, %v2011_v5 }
 0x18c   : > { %v2019_v57 = vpop.eup %2018  ;;  %2036 = vpow2.f32 %v1169_v13 }
 0x18d   : > { %v2021_v58 = vpop.eup %2020  ;;  %2038 = vpow2.f32 %v1171_v52  ;;  %1741 = vmatpush1.bf16.msra.mxu1 %v1740_v53 }
 0x18e   : > { %v2023_v59 = vpop.eup %2022  ;;  %1742 = vmatprep.subr.bf16.mxu1 %v2081_v55  ;;  %v1749_v56 = vpack.c.bf16 %v2021_v58, %v2017_v51 }
 0x18f   : > { %v2025_v39 = vpop.eup %2024  ;;  %v1013_v9 = vmul.f32 0.6931472, %v2023_v59 }
 0x190   : > { %v2027_v17 = vpop.eup %2026  ;;  %v1009_v0 = vmul.f32 0.6931472, %v2025_v39 }
 0x191   : > { %v2029_v8 = vpop.eup %2028  ;;  %v1071_v61 = vmul.f32 %v2226_v63, %v1013_v9  ;;  %v1015_v62 = vmul.f32 0.6931472, %v2027_v17  ;;  %1744 = vmatpush1.bf16.msra.mxu1 %v1743_v49 }
 0x192   : > { %v2031_v1 = vpop.eup %2030  ;;  %v1069_v37 = vmul.f32 %v2226_v63, %v1009_v0  ;;  %v1011_v2 = vmul.f32 0.6931472, %v2029_v8  ;;  %1745 = vmatprep.subr.bf16.mxu1 %v2081_v55 }
 0x193   : > { %v2033_v3 = vpop.eup %2032  ;;  %v1181_v6 = vmul.f32 1.442695, %v1071_v61  ;;  %v1072_v7 = vmul.f32 %v2226_v63, %v1015_v62  ;;  %v1746_v10 = vpack.c.bf16 %v2031_v1, %v2019_v57 }
 0x194   : > { %v1177_v11 = vmul.f32 1.442695, %v1069_v37  ;;  %v1070_v12 = vmul.f32 %v2226_v63, %v1011_v2 }
 0x195   : > { %v2035_v24 = vpop.eup %2034  ;;  %2040 = vpow2.f32 %v1181_v6  ;;  %v1183_v34 = vmul.f32 1.442695, %v1072_v7  ;;  %1747 = vmatpush1.bf16.msra.mxu1 %v1746_v10 }
 0x196   : > { %v2037_v43 = vpop.eup %2036  ;;  %2042 = vpow2.f32 %v1177_v11  ;;  %v1179_v14 = vmul.f32 1.442695, %v1070_v12  ;;  %1748 = vmatprep.subr.bf16.mxu1 %v2081_v55  ;;  %v1755_v16 = vpack.c.bf16 %v2035_v24, %v2033_v3 }
 0x197   : > { %v2039_v19 = vpop.eup %2038  ;;  %2044 = vpow2.f32 %v1183_v34 }
 0x198   : > { %2046 = vpow2.f32 %v1179_v14  ;;  %v1752_v27 = vpack.c.bf16 %v2039_v19, %v2037_v43 }
 0x199   : > { %1750 = vmatpush1.bf16.msra.mxu1 %v1749_v56 }
 0x19a   : > { %1751 = vmatprep.subr.bf16.mxu1 %v2081_v55 }
 0x19d   : > { %1753 = vmatpush1.bf16.msra.mxu1 %v1752_v27 }
 0x19e   : > { %1754 = vmatprep.subr.bf16.mxu1 %v2081_v55 }
 0x19f   : > { %v2041_v63 = vpop.eup %2040 }
 0x1a0   : > { %v2043_v38 = vpop.eup %2042 }
 0x1a1   : > { %v2045_v50 = vpop.eup %2044  ;;  %1756 = vmatpush1.bf16.msra.mxu1 %v1755_v16 }
 0x1a2   : > { %v2047_v21 = vpop.eup %2046  ;;  %1757 = vmatprep.subr.bf16.mxu1 %v2081_v55  ;;  %v1761_v22 = vpack.c.bf16 %v2045_v50, %v2041_v63 }
 0x1a3   : > { %v1758_v26 = vpack.c.bf16 %v2047_v21, %v2043_v38 }
 0x1a5   : > { %1759 = vmatpush1.bf16.msra.mxu1 %v1758_v26 }
 0x1a6   : > { %1760 = vmatprep.subr.bf16.mxu1 %v2081_v55 }
 0x1a9   : > { %1762 = vmatpush1.bf16.msra.mxu1 %v1761_v22 }
 0x1aa   : > { %1763 = vmatprep.subr.bf16.mxu1 %v2081_v55 }
 0x1ac   : > { %1328 = vmatmul.mubr.f32.vlgmr.msra.gmra.mrb[2].mxu1 %v1187_v28 }
 0x1ad   : > { %1765 = vmatpush3.bf16.msra.mxu1 %v1764_v48  ;;  %1692 = vmatprep.mubr.msk.f32.mxu1 %vm2082_vm1, %v2083_v30 }
 0x24f   : > { %v1610_v31 = vpop.f32.mrb[0].mxu1 }
 0x250   : > { %v1611_v60 = vpop.f32.mrb[1].mxu1 }
 0x251   : > { %v1612_v15 = vadd.f32 %v1611_v60, %v1610_v31 }
 0x27f   : > { %v1329_v33 = vpop.f32.mrb[2].mxu1 }
 0x280   : > { %v1330_v55 = vadd.f32 %v1612_v15, %v1329_v33  ;;  %v1331_v35 = vpop.f32.mrb[3].mxu1 }
 0x282   : > { %2048 = vlog2.f32 %v1330_v55 }
 0x28c   : > { %v2049_v36 = vpop.eup %2048 }
 0x28d   : > { %v1334_v20 = vmul.f32 0.6931472, %v2049_v36 }
 0x28f   : > { %v1336_v4 = vmul.f32 %v1335_v40, %v1334_v20 }
 0x291   : > { %v1337_v41 = vmul.f32 1.442695, %v1336_v4 }
 0x293   : > { %2050 = vpow2.f32 %v1337_v41 }
 0x29d   : > { %v2051_v42 = vpop.eup %2050 }
 0x29e   : > { %v1339_v23 = vmax.f32 %v2051_v42, 0.0 }
 0x2a0   : > { %1693 = vmatmul.mubr.msk.f32.vlgmr.msra.gmra.mrb[4].mxu1 %vm1349_vm2, %v1339_v23 }
 0x373   : > { %v1419_v54 = vpop.f32.mrb[4].mxu1 }
 0x374   : > { %v1420_v44 = vadd.f32 %v1538_v32, %v1419_v54  ;;  %v1694_v5 = vpop.f32.mrb[5].mxu1 }
 0x376   : > { %1424 = vst.msk [vmem:[%s292_s11] sm:$0xff] %vm1423_vm3, %v1420_v44 }
 0x377 PF: > { %s18_s24 = sadd.s32 1, %s2078_s24  }
 0x378   : > { %p15_p2 = scmp.ge.s32.totalorder %s18_s24, 4  }
 0x37a   :  { %17 = sbr.rel (!%p15_p2) target bundleno = 1 (0x1), region = 83 }
 0x381   :  { %1444 = vsyncpa [#allocation3], 1 }
 0x382   :  { %1446 = vsyncpa [#allocation3 + $0x1], 1 }

</bundles_post_ra>
